<compile_context>
chip_gen: v6e
topology: v6e:2x2x1
jax: 0.10.0
libtpu: 0.0.40
codegen_flags: <defaults>
</compile_context>

<pallas_src>
import jax
import jax.numpy as jnp
from jax.experimental import pallas as pl
from jax.experimental.pallas import tpu as pltpu

HIDDEN = 64          # LSTM hidden size (fixed by the module)
LANES = 128          # TPU lane width
MAX_TILE_B = 4096    # max batch rows per grid step
MIN_TILE_B = 1024    # don't shrink tiles below this just to raise the grid size

# dot_general dimension numbers for A @ B^T (contract the last dim of both):
# the standard MXU "transposed rhs" form (same as flash attention's q @ k^T).
_NT_DIMS = (((1,), (1,)), ((), ()))


def _cdiv(a, b):
    return (a + b - 1) // b


def _round_up(n, m):
    return _cdiv(n, m) * m


def _sigmoid(x):
    # sigmoid(x) = 0.5 * (1 + tanh(x/2)): a single EUP transcendental (tanh);
    # the scale/shift runs on the under-utilised VPU.  Exact — no approx recip.
    return 0.5 * jnp.tanh(0.5 * x) + 0.5


def _fraud_lstm_kernel(x_ref, w_ih_ref, b_g_ref, w_fc_ref, b_fc_ref, out_ref):
    """One batch tile: single-step LSTM cell (h0 = c0 = 0) + Linear(64->1) + Sigmoid."""
    H = HIDDEN

    # x arrives f32 straight from HBM (no wrapper pad/cast pass); cast to bf16
    # only for the MXU operands.  K = F (e.g. 16) needs no padding.
    x = x_ref[...].astype(jnp.bfloat16)                       # (TB, F)   bf16
    gates = jnp.dot(x, w_ih_ref[...],
                    preferred_element_type=jnp.float32)       # (TB, 3H)  f32
    gates = gates + b_g_ref[...]

    # NOTE: the 64-wide gate slices sit at different lane offsets; the resulting
    # XLU rotate is free filler (XLU is idle) — do NOT pad gates to 128 lanes.
    i_g = _sigmoid(gates[:, 0 * H:1 * H])
    g_g = jnp.tanh(gates[:, 1 * H:2 * H])
    o_g = _sigmoid(gates[:, 2 * H:3 * H])

    c = i_g * g_g                      # forget-gate term vanishes (c0 == 0)
    h = o_g * jnp.tanh(c)              # (TB, H) f32

    # TODO(synk): dropout(p=0.2) is identity in eval mode; no PRNG mask applied.

    # fc (64 -> 1) as an MXU matmul with transposed rhs: w_fc (8, H) @ h (TB, H)^T
    # -> (8, TB).  This puts the batch on the LANE axis so the output block is
    # lane-dense (unmasked full-lane stores, tiny VMEM), with no explicit
    # transpose/reshape.  Rows 1..7 of w_fc are zero padding; row 0 is the result.
    logits = jax.lax.dot_general(w_fc_ref[...], h, _NT_DIMS,
                                 preferred_element_type=jnp.float32)   # (8, TB)
    logits = logits[0:1, :] + b_fc_ref[0, 0]                           # (1, TB)
    out_ref[...] = _sigmoid(logits)


@jax.jit
def fraud_lstm_forward(x, w_ih_t, b_gates, w_fc_mat, b_fc):
    """x: (B, F) float32 -> (B, 1) float32 probabilities."""
    B, F = x.shape
    G3 = w_ih_t.shape[1]               # 3 * HIDDEN  ([i, g, o] — f elided)

    # Tile sizing: amortise the ~0.35 us per-step overhead, bound padding waste
    # when B is just over a tile multiple, and give v7x's two TensorCores >= 2
    # tiles each when the batch is large enough to split.
    num_tiles = max(_cdiv(B, MAX_TILE_B), min(4, _cdiv(B, MIN_TILE_B)))
    tile_b = _round_up(_cdiv(B, num_tiles), LANES)
    num_tiles = _cdiv(B, tile_b)
    b_pad = num_tiles * tile_b

    xp = x if b_pad == B else jnp.pad(x, ((0, b_pad - B), (0, 0)))

    out = pl.pallas_call(
        _fraud_lstm_kernel,
        out_shape=jax.ShapeDtypeStruct((1, b_pad), jnp.float32),
        grid=(num_tiles,),
        in_specs=[
            pl.BlockSpec((tile_b, F), lambda i: (i, 0)),          # x tile (pipelined)
            pl.BlockSpec((F, G3), lambda i: (0, 0)),              # W_ih^T [i,g,o] (resident)
            pl.BlockSpec((1, G3), lambda i: (0, 0)),              # b_ih + b_hh [i,g,o]
            pl.BlockSpec((8, HIDDEN), lambda i: (0, 0)),          # fc weight (row 0 real)
            pl.BlockSpec((1, 1), lambda i: (0, 0),
                         memory_space=pltpu.MemorySpace.SMEM),    # fc bias scalar
        ],
        out_specs=pl.BlockSpec((1, tile_b), lambda i: (0, i)),    # lane-dense output
        compiler_params=pltpu.CompilerParams(
            dimension_semantics=("parallel",),    # shard batch tiles across v7x's 2 TCs
        ),
    )(xp, w_ih_t, b_gates, w_fc_mat, b_fc)

    return out.reshape(-1, 1)[:B]       # padded rows are sliced off


def init_params(key, input_size, hidden=HIDDEN):
    """Deterministic init mimicking PyTorch's U(-1/sqrt(H), 1/sqrt(H))."""
    k = 1.0 / jnp.sqrt(jnp.float32(hidden))
    keys = jax.random.split(key, 5)
    w_ih = jax.random.uniform(keys[0], (4 * hidden, input_size), jnp.float32, -k, k)
    b_ih = jax.random.uniform(keys[1], (4 * hidden,), jnp.float32, -k, k)
    b_hh = jax.random.uniform(keys[2], (4 * hidden,), jnp.float32, -k, k)
    # (W_hh exists in the PyTorch module but multiplies h0 == 0 -> irrelevant.)
    w_fc = jax.random.uniform(keys[3], (1, hidden), jnp.float32, -k, k)
    b_fc = jax.random.uniform(keys[4], (1,), jnp.float32, -k, k)

    H = hidden
    # PyTorch gate order is [i, f, g, o]; f is mathematically dead (c0 == 0),
    # so pack only the [i, g, o] columns for the kernel.
    sel = jnp.concatenate(
        [jnp.arange(0, H), jnp.arange(2 * H, 3 * H), jnp.arange(3 * H, 4 * H)])
    w_igo = w_ih[sel, :]                      # (3H, F)
    b_igo = (b_ih + b_hh)[sel]                # (3H,)

    # fc weight padded to one full sublane tile (8 rows, row 0 real) so the
    # transposed-rhs fc matmul has an aligned M dim; the pad is 7*64 floats.
    w_fc_mat = jnp.zeros((8, H), jnp.float32).at[0].set(w_fc[0])

    return dict(
        # kernel inputs
        w_ih_t=w_igo.T.astype(jnp.bfloat16),      # (F, 3H)  bf16 (resident, tiny)
        b_gates=b_igo.reshape(1, 3 * H),          # (1, 3H)  f32
        w_fc_mat=w_fc_mat,                        # (8, H)   f32
        b_fc=b_fc.reshape(1, 1),                  # (1, 1)   f32 (SMEM scalar)
        # full-precision copies for the reference path
        ref_w_igo_t=w_igo.T,                      # (F, 3H)  f32
        ref_w_fc=w_fc,                            # (1, H)   f32
    )


def reference_forward(x, params):
    """Plain-JAX f32 reference for a correctness sanity check."""
    H = HIDDEN
    gates = x @ params["ref_w_igo_t"] + params["b_gates"]
    i = jax.nn.sigmoid(gates[:, 0:H])
    g = jnp.tanh(gates[:, H:2 * H])
    o = jax.nn.sigmoid(gates[:, 2 * H:3 * H])
    h = o * jnp.tanh(i * g)
    logits = h @ params["ref_w_fc"].T + params["b_fc"]
    return jax.nn.sigmoid(logits)


if __name__ == "__main__":
    key = jax.random.PRNGKey(0)
    k_param, k_x = jax.random.split(key)

    batch, input_size = 8, 16
    params = init_params(k_param, input_size)
    x = jax.random.normal(k_x, (batch, input_size), jnp.float32)

    out = fraud_lstm_forward(
        x, params["w_ih_t"], params["b_gates"], params["w_fc_mat"], params["b_fc"]
    )
    out = jax.block_until_ready(out)

    ref = reference_forward(x, params)
    assert out.shape == (batch, 1)
    # bf16 gate-matmul operands -> loosened tolerance vs the f32 reference.
    assert jnp.allclose(out, ref, atol=5e-3, rtol=5e-3), "mismatch vs reference"

    print("KERNEL_OK")
</pallas_src>

<mosaic_0001>
module attributes {stable_mosaic.version = 11 : i64} {
  func.func @_fraud_lstm_kernel(%arg0: i32, %arg1: memref<128x16xf32, #tpu.memory_space<vmem>>, %arg2: memref<16x192xbf16, #tpu.memory_space<vmem>>, %arg3: memref<1x192xf32, #tpu.memory_space<vmem>>, %arg4: memref<8x64xf32, #tpu.memory_space<vmem>>, %arg5: memref<1x1xf32, #tpu.memory_space<smem>>, %arg6: memref<1x128xf32, #tpu.memory_space<vmem>>) attributes {dimension_semantics = [#tpu.dimension_semantics<parallel>], iteration_bounds = array<i64: 1>, scalar_prefetch = 0 : i64, scratch_operands = 0 : i64, tpu.core_type = #tpu.core_type<tc>, window_params = [{transform_indices = @transform_0, window_bounds = array<i64: 128, 16>}, {pipeline_mode = #tpu.pipeline_mode<synchronous>, transform_indices = @transform_1, window_bounds = array<i64: 16, 192>}, {pipeline_mode = #tpu.pipeline_mode<synchronous>, transform_indices = @transform_2, window_bounds = array<i64: 1, 192>}, {pipeline_mode = #tpu.pipeline_mode<synchronous>, transform_indices = @transform_3, window_bounds = array<i64: 8, 64>}, {transform_indices = @transform_4, window_bounds = array<i64: 1, 1>}, {transform_indices = @transform_5, window_bounds = array<i64: 1, 128>}]} {
    %c0 = arith.constant 0 : index
    %c0_0 = arith.constant 0 : index
    %0 = vector.load %arg1[%c0, %c0_0] : memref<128x16xf32, #tpu.memory_space<vmem>>, vector<128x16xf32>
    %1 = arith.truncf %0 : vector<128x16xf32> to vector<128x16xbf16>
    %c0_1 = arith.constant 0 : index
    %c0_2 = arith.constant 0 : index
    %2 = vector.load %arg2[%c0_1, %c0_2] : memref<16x192xbf16, #tpu.memory_space<vmem>>, vector<16x192xbf16>
    %cst = arith.constant dense<0.000000e+00> : vector<128x192xf32>
    %3 = tpu.matmul %1, %2, %cst {dimension_numbers = #tpu.dot_dimension_numbers<[1], [0], [0], [1], [0, 0, 1, 1], [], []>} : vector<128x16xbf16>, vector<16x192xbf16>, vector<128x192xf32> -> vector<128x192xf32>
    %c0_3 = arith.constant 0 : index
    %c0_4 = arith.constant 0 : index
    %4 = vector.load %arg3[%c0_3, %c0_4] : memref<1x192xf32, #tpu.memory_space<vmem>>, vector<1x192xf32>
    %5 = vector.broadcast %4 : vector<1x192xf32> to vector<128x192xf32>
    %6 = arith.addf %3, %5 : vector<128x192xf32>
    %7 = vector.extract_strided_slice %6 {offsets = [0, 0], sizes = [128, 64], strides = [1, 1]} : vector<128x192xf32> to vector<128x64xf32>
    %cst_5 = arith.constant 5.000000e-01 : f32
    %8 = vector.broadcast %cst_5 : f32 to vector<128x64xf32>
    %9 = arith.mulf %8, %7 : vector<128x64xf32>
    %10 = math.tanh %9 : vector<128x64xf32>
    %cst_6 = arith.constant 5.000000e-01 : f32
    %11 = vector.broadcast %cst_6 : f32 to vector<128x64xf32>
    %12 = arith.mulf %11, %10 : vector<128x64xf32>
    %cst_7 = arith.constant 5.000000e-01 : f32
    %13 = vector.broadcast %cst_7 : f32 to vector<128x64xf32>
    %14 = arith.addf %12, %13 : vector<128x64xf32>
    %15 = vector.extract_strided_slice %6 {offsets = [0, 64], sizes = [128, 64], strides = [1, 1]} : vector<128x192xf32> to vector<128x64xf32>
    %16 = math.tanh %15 : vector<128x64xf32>
    %17 = vector.extract_strided_slice %6 {offsets = [0, 128], sizes = [128, 64], strides = [1, 1]} : vector<128x192xf32> to vector<128x64xf32>
    %cst_8 = arith.constant 5.000000e-01 : f32
    %18 = vector.broadcast %cst_8 : f32 to vector<128x64xf32>
    %19 = arith.mulf %18, %17 : vector<128x64xf32>
    %20 = math.tanh %19 : vector<128x64xf32>
    %cst_9 = arith.constant 5.000000e-01 : f32
    %21 = vector.broadcast %cst_9 : f32 to vector<128x64xf32>
    %22 = arith.mulf %21, %20 : vector<128x64xf32>
    %cst_10 = arith.constant 5.000000e-01 : f32
    %23 = vector.broadcast %cst_10 : f32 to vector<128x64xf32>
    %24 = arith.addf %22, %23 : vector<128x64xf32>
    %25 = arith.mulf %14, %16 : vector<128x64xf32>
    %26 = math.tanh %25 : vector<128x64xf32>
    %27 = arith.mulf %24, %26 : vector<128x64xf32>
    %c0_11 = arith.constant 0 : index
    %c0_12 = arith.constant 0 : index
    %28 = vector.load %arg4[%c0_11, %c0_12] : memref<8x64xf32, #tpu.memory_space<vmem>>, vector<8x64xf32>
    %cst_13 = arith.constant dense<0.000000e+00> : vector<8x128xf32>
    %29 = tpu.matmul %28, %27, %cst_13 {dimension_numbers = #tpu.dot_dimension_numbers<[1], [1], [0], [0], [0, 0, 1, 0], [], []>} : vector<8x64xf32>, vector<128x64xf32>, vector<8x128xf32> -> vector<8x128xf32>
    %30 = vector.extract_strided_slice %29 {offsets = [0, 0], sizes = [1, 128], strides = [1, 1]} : vector<8x128xf32> to vector<1x128xf32>
    %c0_14 = arith.constant 0 : index
    %c0_15 = arith.constant 0 : index
    %31 = memref.load %arg5[%c0_14, %c0_15] : memref<1x1xf32, #tpu.memory_space<smem>>
    %32 = vector.broadcast %31 : f32 to vector<1x128xf32>
    %33 = arith.addf %30, %32 : vector<1x128xf32>
    %cst_16 = arith.constant 5.000000e-01 : f32
    %34 = vector.broadcast %cst_16 : f32 to vector<1x128xf32>
    %35 = arith.mulf %34, %33 : vector<1x128xf32>
    %36 = math.tanh %35 : vector<1x128xf32>
    %cst_17 = arith.constant 5.000000e-01 : f32
    %37 = vector.broadcast %cst_17 : f32 to vector<1x128xf32>
    %38 = arith.mulf %37, %36 : vector<1x128xf32>
    %cst_18 = arith.constant 5.000000e-01 : f32
    %39 = vector.broadcast %cst_18 : f32 to vector<1x128xf32>
    %40 = arith.addf %38, %39 : vector<1x128xf32>
    %c0_19 = arith.constant 0 : index
    %c0_20 = arith.constant 0 : index
    %41 = vector.load %arg6[%c0_19, %c0_20] : memref<1x128xf32, #tpu.memory_space<vmem>>, vector<1x128xf32>
    tpu.vector_store %arg6[%c0_19, %c0_20], %40 {strides = array<i32>} : memref<1x128xf32, #tpu.memory_space<vmem>>, vector<1x128xf32>,
    return
  }
  func.func @transform_0(%arg0: i32) -> (i32, i32) {
    %c0_i32 = arith.constant 0 : i32
    %c0_i32_0 = arith.constant 0 : i32
    return %arg0, %c0_i32 : i32, i32
  }
  func.func @transform_1(%arg0: i32) -> (i32, i32) {
    %c0_i32 = arith.constant 0 : i32
    %c0_i32_0 = arith.constant 0 : i32
    %c0_i32_1 = arith.constant 0 : i32
    return %c0_i32, %c0_i32_0 : i32, i32
  }
  func.func @transform_2(%arg0: i32) -> (i32, i32) {
    %c0_i32 = arith.constant 0 : i32
    %c0_i32_0 = arith.constant 0 : i32
    %c0_i32_1 = arith.constant 0 : i32
    return %c0_i32, %c0_i32_0 : i32, i32
  }
  func.func @transform_3(%arg0: i32) -> (i32, i32) {
    %c0_i32 = arith.constant 0 : i32
    %c0_i32_0 = arith.constant 0 : i32
    %c0_i32_1 = arith.constant 0 : i32
    return %c0_i32, %c0_i32_0 : i32, i32
  }
  func.func @transform_4(%arg0: i32) -> (i32, i32) {
    %c0_i32 = arith.constant 0 : i32
    %c0_i32_0 = arith.constant 0 : i32
    %c0_i32_1 = arith.constant 0 : i32
    return %c0_i32, %c0_i32_0 : i32, i32
  }
  func.func @transform_5(%arg0: i32) -> (i32, i32) {
    %c0_i32 = arith.constant 0 : i32
    %c0_i32_0 = arith.constant 0 : i32
    return %c0_i32, %arg0 : i32, i32
  }
}

</mosaic_0001>

<bundles_post_ra>
// kernel: fraud_lstm_forward.1
= control target key start
LH: loop header
LB: loop body
LE: loop exit
PB: predicated region body
PF: predicated region fallthrough
CT: control target
= control target key end

     0   :  { %v815_v1 = vmov 0   ;;  %vm70_vm0 = vcmask 130048   ;;  %v50_v27 = vlaneseq  ;;  %vm818_vm1 = vmmov 0   ;;  %s1129_s1 = inlined_call_operand.vmem [shape: bf16[16,192], index: 1, kind: input, shape index: {}]   ;;  %s1130_s0 = inlined_call_operand.vmem [shape: f32[128,16], index: 0, kind: input, shape index: {}]   ;;  %s1131_s2 = inlined_call_operand.vmem [shape: f32[1,192], index: 2, kind: input, shape index: {}]   ;;  %s1132_s3 = inlined_call_operand.vmem [shape: f32[8,64], index: 3, kind: input, shape index: {}]   ;;  %s1133_s4 = inlined_call_operand.<no memory space> [shape: f32[1,1], index: 4, kind: input, shape index: {}]   ;;  %s1134_s5 = inlined_call_operand.vmem [shape: f32[1,128], index: 5, kind: output, shape index: {}]  }
   0x1   :  { %v682_v0 = vld [vmem:[%s1129_s1 + $0x4] ss:$8 sps:$4 sm:$0xff]   ;;  %127 = vmatprep.mubr.bf16.mxu0 %v815_v1  ;;  %v684_v2 = vld [vmem:[%s1129_s1] ss:$8 sps:$4 sm:$0xff]   ;;  %v24_v6 = vld [vmem:[%s1130_s0 + $0x10] sm:$0xff]  ;;  %vm465_vm2 = vcmask 523264  }
   0x2   :  { %v22_v3 = vld [vmem:[%s1130_s0] sm:$0xff]  ;;  %v23_v4 = vld [vmem:[%s1130_s0 + $0x8] sm:$0xff]  ;;  %109 = vmatprep.subr.bf16.mxu0 %v682_v0  ;;  %v25_v7 = vld [vmem:[%s1130_s0 + $0x18] sm:$0xff]  ;;  %v51_v28 = vshrl.u32 %v50_v27, 7 }
   0x3   :  { %v38_v5 = vpack.c.bf16 %v23_v4, %v22_v3  ;;  %110 = vmatpush1.bf16.msra.mxu0 %v684_v2  ;;  %v39_v8 = vpack.c.bf16 %v25_v7, %v24_v6  ;;  %v26_v9 = vld [vmem:[%s1130_s0 + $0x20] sm:$0xff]  ;;  %v27_v10 = vld [vmem:[%s1130_s0 + $0x28] sm:$0xff]  ;;  %v28_v12 = vld [vmem:[%s1130_s0 + $0x30] sm:$0xff] }
   0x4   :  { %v40_v11 = vpack.c.bf16 %v27_v10, %v26_v9  ;;  %v29_v13 = vld [vmem:[%s1130_s0 + $0x38] sm:$0xff]  ;;  %v30_v15 = vld [vmem:[%s1130_s0 + $0x40] sm:$0xff]  ;;  %v31_v16 = vld [vmem:[%s1130_s0 + $0x48] sm:$0xff]  ;;  %v56_v29 = vsub.s32 1, %v51_v28  ;;  %v52_v3 = vsub.s32 0, %v51_v28 }
   0x5   :  { %v41_v14 = vpack.c.bf16 %v29_v13, %v28_v12  ;;  %v42_v17 = vpack.c.bf16 %v31_v16, %v30_v15  ;;  %v32_v18 = vld [vmem:[%s1130_s0 + $0x50] sm:$0xff]  ;;  %v33_v19 = vld [vmem:[%s1130_s0 + $0x58] sm:$0xff]  ;;  %v34_v21 = vld [vmem:[%s1130_s0 + $0x60] sm:$0xff] }
   0x6   :  { %601 = vmatmul.mubr.msk.bf16.vlgmr.msra.gmra.mxu0 %vm70_vm0, %v38_v5  ;;  %v43_v20 = vpack.c.bf16 %v33_v19, %v32_v18  ;;  %v35_v22 = vld [vmem:[%s1130_s0 + $0x68] sm:$0xff]  ;;  %v36_v24 = vld [vmem:[%s1130_s0 + $0x70] sm:$0xff]  ;;  %v37_v25 = vld [vmem:[%s1130_s0 + $0x78] sm:$0xff]  ;;  %s816_s0 = smov 64  }
   0x7   :  { %137 = vmatprep.mubr.bf16.mxu0 %v815_v1  ;;  %v44_v23 = vpack.c.bf16 %v35_v22, %v34_v21  ;;  %v45_v26 = vpack.c.bf16 %v37_v25, %v36_v24  ;;  %v48_v30 = vld [vmem:[%s1131_s2] sm:$0x3] }
   0x8   :  { %v914_v31 = vrot.slane %v48_v30, %v56_v29  ;;  %v53_v7 = vrot.slane %v48_v30, %v52_v3 }
   0xe   :  { %602 = vmatmul.mubr.msk.bf16.gmra.mxu0 %vm70_vm0, %v39_v8 }
   0xf   :  { %147 = vmatprep.mubr.bf16.mxu0 %v815_v1 }
  0x16   :  { %603 = vmatmul.mubr.msk.bf16.gmra.mxu0 %vm70_vm0, %v40_v11 }
  0x17   :  { %157 = vmatprep.mubr.bf16.mxu0 %v815_v1 }
  0x1e   :  { %604 = vmatmul.mubr.msk.bf16.gmra.mxu0 %vm70_vm0, %v41_v14 }
  0x1f   :  { %167 = vmatprep.mubr.bf16.mxu0 %v815_v1 }
  0x26   :  { %605 = vmatmul.mubr.msk.bf16.gmra.mxu0 %vm70_vm0, %v42_v17 }
  0x27   :  { %177 = vmatprep.mubr.bf16.mxu0 %v815_v1 }
  0x2e   :  { %606 = vmatmul.mubr.msk.bf16.gmra.mxu0 %vm70_vm0, %v43_v20 }
  0x2f   :  { %187 = vmatprep.mubr.bf16.mxu0 %v815_v1 }
  0x36   :  { %607 = vmatmul.mubr.msk.bf16.gmra.mxu0 %vm70_vm0, %v44_v23 }
  0x37   :  { %197 = vmatprep.mubr.bf16.mxu0 %v815_v1 }
  0x3e   :  { %608 = vmatmul.mubr.msk.bf16.gmra.mxu0 %vm70_vm0, %v45_v26 }
  0xc6   :  { %v916_v32 = vpop.f32.mrf.mxu0 }
  0xc8   :  { %v131_v33 = vpop.f32.mrf.mxu0 }
  0xc9   :  { %v919_v34 = vadd.f32 %v131_v33, %v914_v31 }
  0xca   :  { %v921_v35 = vpop.f32.mrf.mxu0 }
  0xcc   :  { %v135_v36 = vpop.f32.mrf.mxu0 }
  0xcd   :  { %v924_v37 = vadd.f32 %v135_v36, %v914_v31  ;;  %v130_v36 = vadd.f32 %v916_v32, %v53_v7 }
  0xce   :  { %v926_v38 = vpop.f32.mrf.mxu0 }
  0xcf   :  { %v140_v28 = vadd.f32 %v926_v38, %v53_v7 }
  0xd0   :  { %v141_v39 = vpop.f32.mrf.mxu0 }
  0xd1   :  { %v929_v40 = vadd.f32 %v141_v39, %v914_v31 }
  0xd2   :  { %v931_v41 = vpop.f32.mrf.mxu0 }
  0xd4   :  { %v145_v42 = vpop.f32.mrf.mxu0 }
  0xd5   :  { %v934_v43 = vadd.f32 %v145_v42, %v914_v31 }
  0xd6   :  { %v149_v44 = vpop.f32.mrf.mxu0 }
  0xd7   :  { %v994_v25 = vadd.f32 %v149_v44, %v53_v7  ;;  %v817_v44 = vmov 0.0  }
  0xd8   :  { %v151_v45 = vpop.f32.mrf.mxu0  ;;  %643 = vmatprep.subr.mxu1 %v817_v44  ;;  %675 = vmatprep.mubr.msk.f32.mxu1 %vm818_vm1, %v817_v44 }
  0xd9   :  { %v937_v46 = vadd.f32 %v151_v45, %v914_v31 }
  0xda   :  { %v939_v47 = vpop.f32.mrf.mxu0 }
  0xdb   :  { %v1010_v42 = vadd.f32 %v939_v47, %v53_v7 }
  0xdc   :  { %v155_v48 = vpop.f32.mrf.mxu0 }
  0xdd   :  { %v942_v49 = vadd.f32 %v155_v48, %v914_v31  ;;  %v144_v48 = vadd.f32 %v931_v41, %v53_v7 }
  0xde   :  { %v159_v50 = vpop.f32.mrf.mxu0 }
  0xdf   :  { %v987_v22 = vadd.f32 %v159_v50, %v53_v7  ;;  %v134_v50 = vadd.f32 %v921_v35, %v53_v7 }
  0xe0   :  { %v161_v51 = vpop.f32.mrf.mxu0 }
  0xe1   :  { %v945_v52 = vadd.f32 %v161_v51, %v914_v31  ;;  %v209_v3 = vmul.f32 0.5, %v134_v50 }
  0xe2   :  { %v163_v53 = vpop.f32.mrf.mxu0 }
  0xe3   :  { %v1003_v30 = vadd.f32 %v163_v53, %v53_v7 }
  0xe4   :  { %v165_v54 = vpop.f32.mrf.mxu0 }
  0xe5   :  { %v948_v55 = vadd.f32 %v165_v54, %v914_v31 }
  0xe6   :  { %v169_v56 = vpop.f32.mrf.mxu0 }
  0xe7   :  { %v981_v20 = vadd.f32 %v169_v56, %v53_v7 }
  0xe8   :  { %v171_v57 = vpop.f32.mrf.mxu0 }
  0xe9   :  { %v951_v58 = vadd.f32 %v171_v57, %v914_v31 }
  0xea   :  { %v173_v59 = vpop.f32.mrf.mxu0 }
  0xeb   :  { %v997_v26 = vadd.f32 %v173_v59, %v53_v7 }
  0xec   :  { %v175_v60 = vpop.f32.mrf.mxu0 }
  0xed   :  { %v954_v61 = vadd.f32 %v175_v60, %v914_v31 }
  0xee   :  { %v179_v62 = vpop.f32.mrf.mxu0 }
  0xef   :  { %v973_v16 = vadd.f32 %v179_v62, %v53_v7  ;;  %v208_v62 = vmul.f32 0.5, %v130_v36 }
  0xf0   :  { %v181_v63 = vpop.f32.mrf.mxu0 }
  0xf1   :  { %v957_v0 = vadd.f32 %v181_v63, %v914_v31  ;;  %v218_v63 = vmul.f32 0.5, %v973_v16 }
  0xf2   :  { %v183_v1 = vpop.f32.mrf.mxu0 }
  0xf3   :  { %v990_v23 = vadd.f32 %v183_v1, %v53_v7 }
  0xf4   :  { %v185_v2 = vpop.f32.mrf.mxu0 }
  0xf5   :  { %v960_v4 = vadd.f32 %v185_v2, %v914_v31  ;;  %v288_v2 = vmul.f32 0.5, %v919_v34 }
  0xf6   :  { %v189_v5 = vpop.f32.mrf.mxu0 }
  0xf7   :  { %v970_v13 = vadd.f32 %v189_v5, %v53_v7  ;;  %v216_v5 = vmul.f32 0.5, %v981_v20 }
  0xf8   :  { %v191_v6 = vpop.f32.mrf.mxu0 }
  0xf9   :  { %v963_v8 = vadd.f32 %v191_v6, %v914_v31  ;;  %v220_v60 = vmul.f32 0.5, %v970_v13 }
  0xfa   :  { %v193_v9 = vpop.f32.mrf.mxu0 }
  0xfb   :  { %v965_v10 = vadd.f32 %v193_v9, %v53_v7  ;;  %v214_v9 = vmul.f32 0.5, %v987_v22 }
  0xfc   :  { %v195_v11 = vpop.f32.mrf.mxu0 }
  0xfd   :  { %v968_v12 = vadd.f32 %v195_v11, %v914_v31  ;;  %685 = vtanh.f32 %v965_v10  ;;  %v221_v59 = vmul.f32 0.5, %v965_v10  ;;  %v219_v10 = vmul.f32 0.5, %v990_v23 }
  0xfe   :  { %v199_v14 = vpop.f32.mrf.mxu0  ;;  %687 = vtanh.f32 %v970_v13 }
  0xff   :  { %689 = vtanh.f32 %v973_v16  ;;  %v984_v21 = vadd.f32 %v199_v14, %v53_v7  ;;  %v301_v11 = vmul.f32 0.5, %v968_v12  ;;  %v290_v14 = vmul.f32 0.5, %v929_v40 }
 0x100   :  { %v201_v15 = vpop.f32.mrf.mxu0  ;;  %v217_v16 = vmul.f32 0.5, %v997_v26  ;;  %v211_v12 = vmul.f32 0.5, %v144_v48 }
 0x101   :  { %v976_v17 = vadd.f32 %v201_v15, %v914_v31  ;;  %v222_v6 = vmul.f32 0.5, %v984_v21  ;;  %v212_v15 = vmul.f32 0.5, %v994_v25 }
 0x102   :  { %v203_v18 = vpop.f32.mrf.mxu0 }
 0x103   :  { %v979_v19 = vadd.f32 %v203_v18, %v53_v7  ;;  %v210_v7 = vmul.f32 0.5, %v140_v28 }
 0x104   :  { %v205_v34 = vpop.f32.mrf.mxu0 }
 0x105   :  { %691 = vtanh.f32 %v979_v19  ;;  %v223_v1 = vmul.f32 0.5, %v979_v19  ;;  %v206_v18 = vadd.f32 %v205_v34, %v914_v31  ;;  %v300_v19 = vmul.f32 0.5, %v963_v8 }
 0x106   :  { %693 = vtanh.f32 %v981_v20  ;;  %v298_v31 = vmul.f32 0.5, %v957_v0  ;;  %v296_v0 = vmul.f32 0.5, %v951_v58 }
 0x107   :  { %695 = vtanh.f32 %v984_v21  ;;  %v303_v40 = vmul.f32 0.5, %v206_v18 }
 0x108   :  { %697 = vtanh.f32 %v987_v22  ;;  %v215_v22 = vmul.f32 0.5, %v1003_v30 }
 0x109   :  { %699 = vtanh.f32 %v990_v23 }
 0x10a   :  { %v686_v24 = vpop.eup %685  ;;  %701 = vtanh.f32 %v994_v25 }
 0x10b   :  { %394 = vrot.lane.b32.xlu1 %v686_v24, %s816_s0  ;;  %v688_v27 = vpop.eup %687  ;;  %703 = vtanh.f32 %v997_v26 }
 0x10c   :  { %v690_v29 = vpop.eup %689  ;;  %705 = vtanh.f32 %v140_v28 }
 0x10d   :  { %707 = vtanh.f32 %v1003_v30 }
 0x10e   :  { %709 = vtanh.f32 %v130_v36  ;;  %v302_v36 = vmul.f32 0.5, %v976_v17  ;;  %v299_v17 = vmul.f32 0.5, %v960_v4  ;;  %v297_v4 = vmul.f32 0.5, %v954_v61 }
 0x10f   :  { %392 = vrot.lane.b32.xlu1 %v688_v27, %s816_s0  ;;  %711 = vtanh.f32 %v1010_v42 }
 0x110   :  { %713 = vtanh.f32 %v144_v48 }
 0x111   :  { %715 = vtanh.f32 %v134_v50 }
 0x112   :  { %v692_v33 = vpop.eup %691  ;;  %717 = vtanh.f32 %v221_v59 }
 0x113   :  { %398 = vrot.lane.b32.xlu0 %v692_v33, %s816_s0  ;;  %388 = vrot.lane.b32.xlu1 %v690_v29, %s816_s0  ;;  %v694_v39 = vpop.eup %693  ;;  %719 = vtanh.f32 %v220_v60  ;;  %v213_v29 = vmul.f32 0.5, %v1010_v42  ;;  %v294_v42 = vmul.f32 0.5, %v945_v52 }
 0x114   :  { %v696_v38 = vpop.eup %695  ;;  %721 = vtanh.f32 %v208_v62 }
 0x115   :  { %v698_v45 = vpop.eup %697  ;;  %723 = vtanh.f32 %v218_v63  ;;  %v292_v63 = vmul.f32 0.5, %v937_v46  ;;  %v295_v46 = vmul.f32 0.5, %v948_v55 }
 0x116   :  { %v700_v32 = vpop.eup %699  ;;  %725 = vtanh.f32 %v223_v1 }
 0x117   :  { %396 = vrot.lane.b32.xlu0 %v696_v38, %s816_s0  ;;  %384 = vrot.lane.b32.xlu1 %v694_v39, %s816_s0  ;;  %v702_v47 = vpop.eup %701  ;;  %727 = vtanh.f32 %v288_v2 }
 0x118   :  { %v704_v51 = vpop.eup %703  ;;  %729 = vtanh.f32 %v209_v3 }
 0x119   :  { %v706_v53 = vpop.eup %705  ;;  %731 = vtanh.f32 %v216_v5 }
 0x11a   :  { %v708_v54 = vpop.eup %707  ;;  %733 = vtanh.f32 %v222_v6 }
 0x11b   :  { %390 = vrot.lane.b32.xlu0 %v700_v32, %s816_s0  ;;  %380 = vrot.lane.b32.xlu1 %v698_v45, %s816_s0  ;;  %v710_v41 = vpop.eup %709  ;;  %735 = vtanh.f32 %v210_v7 }
 0x11c   :  { %v712_v56 = vpop.eup %711  ;;  %737 = vtanh.f32 %v214_v9 }
 0x11d   :  { %v714_v35 = vpop.eup %713  ;;  %739 = vtanh.f32 %v219_v10 }
 0x11e   :  { %v716_v57 = vpop.eup %715  ;;  %741 = vtanh.f32 %v301_v11 }
 0x11f   :  { %386 = vrot.lane.b32.xlu0 %v704_v51, %s816_s0  ;;  %376 = vrot.lane.b32.xlu1 %v702_v47, %s816_s0  ;;  %v718_v13 = vpop.eup %717  ;;  %743 = vtanh.f32 %v290_v14 }
 0x120   :  { %v253_v20 = vmul.f32 0.5, %v718_v13  ;;  %v720_v21 = vpop.eup %719  ;;  %745 = vtanh.f32 %v212_v15 }
 0x121   :  { %v1046_v23 = vpop.eup %721  ;;  %747 = vtanh.f32 %v217_v16  ;;  %v252_v26 = vmul.f32 0.5, %v720_v21 }
 0x122   :  { %v724_v24 = vpop.eup %723  ;;  %749 = vtanh.f32 %v300_v19  ;;  %v269_v25 = vadd.f32 0.5, %v253_v20 }
 0x123   :  { %382 = vrot.lane.b32.xlu0 %v708_v54, %s816_s0  ;;  %372 = vrot.lane.b32.xlu1 %v706_v53, %s816_s0  ;;  %v726_v27 = vpop.eup %725  ;;  %751 = vtanh.f32 %v211_v12  ;;  %v268_v38 = vadd.f32 0.5, %v252_v26  ;;  %v250_v48 = vmul.f32 0.5, %v724_v24 }
 0x124   :  { %v1049_v28 = vpop.eup %727  ;;  %753 = vtanh.f32 %v215_v22  ;;  %v255_v45 = vmul.f32 0.5, %v726_v27 }
 0x125   :  { %v1052_v30 = vpop.eup %729  ;;  %755 = vtanh.f32 %v303_v40 }
 0x126   :  { %v732_v39 = vpop.eup %731 }
 0x127   :  { %378 = vrot.lane.b32.xlu0 %v712_v56, %s816_s0  ;;  %368 = vrot.lane.b32.xlu1 %v710_v41, %s816_s0  ;;  %v734_v32 = vpop.eup %733  ;;  %v248_v54 = vmul.f32 0.5, %v732_v39  ;;  %v271_v56 = vadd.f32 0.5, %v255_v45 }
 0x128   :  { %v1056_v50 = vpop.eup %735 }
 0x129   :  { %v738_v53 = vpop.eup %737  ;;  %v264_v3 = vadd.f32 0.5, %v248_v54 }
 0x12a   :  { %v740_v41 = vpop.eup %739  ;;  %v246_v5 = vmul.f32 0.5, %v738_v53 }
 0x12b   :  { %374 = vrot.lane.b32.xlu0 %v714_v35, %s816_s0  ;;  %v266_v35 = vadd.f32 0.5, %v250_v48  ;;  %v742_v59 = vpop.eup %741  ;;  %v251_v10 = vmul.f32 0.5, %v740_v41 }
 0x12c   :  { %v1060_v62 = vpop.eup %743  ;;  %v333_v7 = vmul.f32 0.5, %v742_v59  ;;  %v262_v18 = vadd.f32 0.5, %v246_v5  ;;  %v240_v59 = vmul.f32 0.5, %v1046_v23 }
 0x12d   :  { %v746_v2 = vpop.eup %745  ;;  %v267_v40 = vadd.f32 0.5, %v251_v10 }
 0x12e   :  { %v748_v6 = vpop.eup %747  ;;  %v244_v20 = vmul.f32 0.5, %v746_v2  ;;  %v349_v22 = vadd.f32 0.5, %v333_v7  ;;  %v256_v23 = vadd.f32 0.5, %v240_v59 }
 0x12f   :  { %370 = vrot.lane.b32.xlu0 %v716_v57, %s816_s0  ;;  %v254_v57 = vmul.f32 0.5, %v734_v32  ;;  %v750_v11 = vpop.eup %749  ;;  %v249_v19 = vmul.f32 0.5, %v748_v6  ;;  %v289_v6 = vmul.f32 0.5, %v924_v37 }
 0x130   :  { %v1064_v14 = vpop.eup %751  ;;  %v332_v12 = vmul.f32 0.5, %v750_v11 }
 0x131   :  { %v270_v9 = vadd.f32 0.5, %v254_v57  ;;  %v754_v61 = vpop.eup %753 }
 0x132   :  { %v756_v21 = vpop.eup %755  ;;  %v247_v39 = vmul.f32 0.5, %v754_v61  ;;  %v348_v48 = vadd.f32 0.5, %v332_v12 }
 0x133   :  { %v335_v32 = vmul.f32 0.5, %v756_v21 }
 0x17d   :  { %v395_v8 = vpop.permute.xlu1 %394 }
 0x17e   :  { %v429_v33 = vmul.f32 %v395_v8, %v269_v25 }
 0x180   :  { %757 = vtanh.f32 %v429_v33 }
 0x181   :  { %759 = vtanh.f32 %v298_v31  ;;  %v393_v47 = vpop.permute.xlu1 %392  ;;  %v293_v31 = vmul.f32 0.5, %v942_v49 }
 0x182   :  { %761 = vtanh.f32 %v213_v29  ;;  %v428_v51 = vmul.f32 %v393_v47, %v268_v38  ;;  %v242_v38 = vmul.f32 0.5, %v1056_v50 }
 0x183   :  { %763 = vtanh.f32 %v302_v36  ;;  %v260_v36 = vadd.f32 0.5, %v244_v20 }
 0x184   :  { %765 = vtanh.f32 %v428_v51  ;;  %v258_v50 = vadd.f32 0.5, %v242_v38 }
 0x185   :  { %767 = vtanh.f32 %v296_v0  ;;  %v399_v58 = vpop.permute.xlu0 %398  ;;  %v389_v60 = vpop.permute.xlu1 %388  ;;  %v265_v0 = vadd.f32 0.5, %v249_v19 }
 0x186   :  { %769 = vtanh.f32 %v294_v42  ;;  %v431_v52 = vmul.f32 %v399_v58, %v271_v56  ;;  %v426_v1 = vmul.f32 %v389_v60, %v266_v35 }
 0x187   :  { %771 = vtanh.f32 %v299_v17  ;;  %v291_v17 = vmul.f32 0.5, %v934_v43 }
 0x188   :  { %773 = vtanh.f32 %v431_v52  ;;  %v263_v52 = vadd.f32 0.5, %v247_v39 }
 0x189   :  { %775 = vtanh.f32 %v426_v1  ;;  %v397_v34 = vpop.permute.xlu0 %396  ;;  %v385_v13 = vpop.permute.xlu1 %384 }
 0x18a   :  { %777 = vtanh.f32 %v292_v63  ;;  %v430_v15 = vmul.f32 %v397_v34, %v270_v9  ;;  %v424_v16 = vmul.f32 %v385_v13, %v264_v3  ;;  %v351_v63 = vadd.f32 0.5, %v335_v32 }
 0x18b   :  { %779 = vtanh.f32 %v297_v4  ;;  %v243_v34 = vmul.f32 0.5, %v1064_v14 }
 0x18c   :  { %781 = vtanh.f32 %v430_v15 }
 0x18d   :  { %v758_v24 = vpop.eup %757  ;;  %783 = vtanh.f32 %v424_v16  ;;  %v391_v25 = vpop.permute.xlu0 %390 }
 0x18e   :  { %v381_v26 = vpop.permute.xlu1 %380  ;;  %v760_v27 = vpop.eup %759  ;;  %v427_v55 = vmul.f32 %v391_v25, %v267_v40  ;;  %v1068_v29 = vmul.f32 %v758_v24, %v349_v22  ;;  %785 = vtanh.f32 %v295_v46  ;;  %v241_v24 = vmul.f32 0.5, %v1052_v30 }
 0x18f   :  { %v422_v8 = vmul.f32 %v381_v26, %v262_v18  ;;  %v762_v33 = vpop.eup %761  ;;  %v330_v42 = vmul.f32 0.5, %v760_v27 }
 0x190   :  { %v764_v45 = vpop.eup %763  ;;  %787 = vtanh.f32 %v427_v55  ;;  %v245_v57 = vmul.f32 0.5, %v762_v33  ;;  %v259_v55 = vadd.f32 0.5, %v243_v34 }
 0x191   :  { %v766_v47 = vpop.eup %765  ;;  %789 = vtanh.f32 %v422_v8  ;;  %v387_v51 = vpop.permute.xlu0 %386  ;;  %v334_v60 = vmul.f32 0.5, %v764_v45  ;;  %v346_v4 = vadd.f32 0.5, %v330_v42  ;;  %v257_v42 = vadd.f32 0.5, %v241_v24 }
 0x192   :  { %v377_v49 = vpop.permute.xlu1 %376  ;;  %v768_v53 = vpop.eup %767  ;;  %v425_v54 = vmul.f32 %v387_v51, %v265_v0  ;;  %v1072_v56 = vmul.f32 %v766_v47, %v348_v48  ;;  %791 = vtanh.f32 %v293_v31  ;;  %v261_v61 = vadd.f32 0.5, %v245_v57 }
 0x193   :  { %v420_v41 = vmul.f32 %v377_v49, %v260_v36  ;;  %v770_v35 = vpop.eup %769  ;;  %v328_v2 = vmul.f32 0.5, %v768_v53  ;;  %v350_v16 = vadd.f32 0.5, %v334_v60  ;;  %v322_v49 = vmul.f32 0.5, %v1060_v62 }
 0x194   :  { %v772_v58 = vpop.eup %771  ;;  %793 = vtanh.f32 %v425_v54  ;;  %v326_v19 = vmul.f32 0.5, %v770_v35  ;;  %v320_v60 = vmul.f32 0.5, %v1049_v28 }
 0x195   :  { %v774_v1 = vpop.eup %773  ;;  %795 = vtanh.f32 %v420_v41  ;;  %v383_v43 = vpop.permute.xlu0 %382  ;;  %v331_v15 = vmul.f32 0.5, %v772_v58  ;;  %v344_v37 = vadd.f32 0.5, %v328_v2 }
 0x196   :  { %v373_v3 = vpop.permute.xlu1 %372  ;;  %v776_v5 = vpop.eup %775  ;;  %v423_v7 = vmul.f32 %v383_v43, %v263_v52  ;;  %v463_v10 = vmul.f32 %v774_v1, %v351_v63  ;;  %797 = vtanh.f32 %v291_v17  ;;  %v342_v36 = vadd.f32 0.5, %v326_v19 }
 0x197   :  { %v418_v9 = vmul.f32 %v373_v3, %v258_v50  ;;  %v778_v11 = vpop.eup %777  ;;  %v1077_v13 = vmul.f32 %v776_v5, %v346_v4  ;;  %v347_v31 = vadd.f32 0.5, %v331_v15  ;;  %v338_v63 = vadd.f32 0.5, %v322_v49 }
 0x198   :  { %v780_v46 = vpop.eup %779  ;;  %799 = vtanh.f32 %v423_v7  ;;  %644 = vmatpush3.xpose.msk.msra.mxu1 %vm465_vm2, %v463_v10  ;;  %v324_v33 = vmul.f32 0.5, %v778_v11  ;;  %v336_v5 = vadd.f32 0.5, %v320_v60  ;;  %v588_v15 = vstv %s1133_s4 }
 0x199   :  { %v782_v18 = vpop.eup %781  ;;  %801 = vtanh.f32 %v418_v9  ;;  %v379_v20 = vpop.permute.xlu0 %378  ;;  %645 = vmatprep.subr.mxu1 %v817_v44  ;;  %v329_v27 = vmul.f32 0.5, %v780_v46 }
 0x19a   :  { %v369_v21 = vpop.permute.xlu1 %368  ;;  %v784_v12 = vpop.eup %783  ;;  %v421_v22 = vmul.f32 %v379_v20, %v261_v61  ;;  %v462_v40 = vmul.f32 %v782_v18, %v350_v16  ;;  %803 = vtanh.f32 %v289_v6  ;;  %v340_v53 = vadd.f32 0.5, %v324_v33 }
 0x19b   :  { %v416_v14 = vmul.f32 %v369_v21, %v256_v23  ;;  %v1082_v25 = vmul.f32 %v784_v12, %v344_v37  ;;  %v786_v26 = vpop.eup %785  ;;  %v345_v47 = vadd.f32 0.5, %v329_v27 }
 0x19c   :  { %805 = vtanh.f32 %v421_v22  ;;  %646 = vmatpush3.xpose.msk.msra.mxu1 %vm465_vm2, %v462_v40  ;;  %v327_v0 = vmul.f32 0.5, %v786_v26 }
 0x19d   :  { %v788_v8 = vpop.eup %787  ;;  %807 = vtanh.f32 %v416_v14  ;;  %v375_v39 = vpop.permute.xlu0 %374  ;;  %647 = vmatprep.subr.mxu1 %v817_v44 }
 0x19e   :  { %v790_v38 = vpop.eup %789  ;;  %v419_v45 = vmul.f32 %v375_v39, %v259_v55  ;;  %v459_v48 = vmul.f32 %v788_v8, %v347_v31  ;;  %v343_v58 = vadd.f32 0.5, %v327_v0 }
 0x19f   :  { %v454_v30 = vmul.f32 %v790_v38, %v342_v36  ;;  %v792_v32 = vpop.eup %791 }
 0x1a0   :  { %809 = vtanh.f32 %v419_v45  ;;  %648 = vmatpush3.xpose.msk.msra.mxu1 %vm465_vm2, %v1068_v29  ;;  %v325_v59 = vmul.f32 0.5, %v792_v32 }
 0x1a1   :  { %v794_v51 = vpop.eup %793  ;;  %v371_v17 = vpop.permute.xlu0 %370  ;;  %649 = vmatprep.subr.mxu1 %v817_v44 }
 0x1a2   :  { %v796_v54 = vpop.eup %795  ;;  %v417_v41 = vmul.f32 %v371_v17, %v257_v42  ;;  %v457_v35 = vmul.f32 %v794_v51, %v345_v47  ;;  %v341_v43 = vadd.f32 0.5, %v325_v59 }
 0x1a3   :  { %v452_v50 = vmul.f32 %v796_v54, %v340_v53  ;;  %v798_v57 = vpop.eup %797 }
 0x1a4   :  { %811 = vtanh.f32 %v417_v41  ;;  %650 = vmatpush3.xpose.msk.msra.mxu1 %vm465_vm2, %v1072_v56  ;;  %v323_v4 = vmul.f32 0.5, %v798_v57 }
 0x1a5   :  { %v800_v29 = vpop.eup %799  ;;  %651 = vmatprep.subr.mxu1 %v817_v44 }
 0x1a6   :  { %v802_v62 = vpop.eup %801  ;;  %v455_v52 = vmul.f32 %v800_v29, %v343_v58  ;;  %v339_v28 = vadd.f32 0.5, %v323_v4 }
 0x1a7   :  { %v450_v1 = vmul.f32 %v802_v62, %v338_v63  ;;  %v804_v2 = vpop.eup %803 }
 0x1a8   :  { %652 = vmatpush3.xpose.msk.msra.mxu1 %vm465_vm2, %v459_v48  ;;  %v321_v9 = vmul.f32 0.5, %v804_v2 }
 0x1a9   :  { %v806_v3 = vpop.eup %805  ;;  %653 = vmatprep.subr.mxu1 %v817_v44 }
 0x1aa   :  { %v808_v6 = vpop.eup %807  ;;  %v453_v56 = vmul.f32 %v806_v3, %v341_v43  ;;  %v337_v23 = vadd.f32 0.5, %v321_v9 }
 0x1ab   :  { %v448_v7 = vmul.f32 %v808_v6, %v336_v5 }
 0x1ac   :  { %654 = vmatpush3.xpose.msk.msra.mxu1 %vm465_vm2, %v1077_v13  ;;  %v464_v13 = vld [vmem:[%s1132_s3] sm:$0xff] }
 0x1ad   :  { %v810_v10 = vpop.eup %809  ;;  %655 = vmatprep.subr.mxu1 %v817_v44 }
 0x1ae   :  { %v451_v11 = vmul.f32 %v810_v10, %v339_v28 }
 0x1b0   :  { %656 = vmatpush3.xpose.msk.msra.mxu1 %vm465_vm2, %v457_v35 }
 0x1b1   :  { %v812_v34 = vpop.eup %811  ;;  %657 = vmatprep.subr.mxu1 %v817_v44 }
 0x1b2   :  { %v449_v46 = vmul.f32 %v812_v34, %v337_v23 }
 0x1b4   :  { %658 = vmatpush3.xpose.msk.msra.mxu1 %vm465_vm2, %v1082_v25 }
 0x1b5   :  { %659 = vmatprep.subr.mxu1 %v817_v44 }
 0x1b8   :  { %660 = vmatpush3.xpose.msk.msra.mxu1 %vm465_vm2, %v455_v52 }
 0x1b9   :  { %661 = vmatprep.subr.mxu1 %v817_v44 }
 0x1bc   :  { %662 = vmatpush3.xpose.msk.msra.mxu1 %vm465_vm2, %v454_v30 }
 0x1bd   :  { %663 = vmatprep.subr.mxu1 %v817_v44 }
 0x1c0   :  { %664 = vmatpush3.xpose.msk.msra.mxu1 %vm465_vm2, %v453_v56 }
 0x1c1   :  { %665 = vmatprep.subr.mxu1 %v817_v44 }
 0x1c4   :  { %666 = vmatpush3.xpose.msk.msra.mxu1 %vm465_vm2, %v452_v50 }
 0x1c5   :  { %667 = vmatprep.subr.mxu1 %v817_v44 }
 0x1c8   :  { %668 = vmatpush3.xpose.msk.msra.mxu1 %vm465_vm2, %v451_v11 }
 0x1c9   :  { %669 = vmatprep.subr.mxu1 %v817_v44 }
 0x1cc   :  { %670 = vmatpush3.xpose.msk.msra.mxu1 %vm465_vm2, %v450_v1 }
 0x1cd   :  { %671 = vmatprep.subr.mxu1 %v817_v44 }
 0x1d0   :  { %672 = vmatpush3.xpose.msk.msra.mxu1 %vm465_vm2, %v449_v46 }
 0x1d1   :  { %673 = vmatprep.subr.mxu1 %v817_v44 }
 0x1d4   :  { %674 = vmatpush3.xpose.msk.msra.mxu1 %vm465_vm2, %v448_v7 }
 0x1d7   :  { %676 = vmatmul.mubr.msk.f32.vlgmr.msra.gmra.mxu1 %vm465_vm2, %v464_v13 }
 0x297   :  { %v583_v16 = vpop.f32.mrf.mxu1 }
 0x298   :  { %v589_v61 = vadd.f32 %v588_v15, %v583_v16 }
 0x299   :  { %v677_v18 = vpop.f32.mrf.mxu1 }
 0x29a   :  { %v590_v19 = vmul.f32 0.5, %v589_v61 }
 0x29c   :  { %813 = vtanh.f32 %v590_v19 }
 0x2a9   :  { %v814_v37 = vpop.eup %813 }
 0x2aa   :  { %v592_v20 = vmul.f32 0.5, %v814_v37 }
 0x2ac   :  { %v593_v44 = vadd.f32 0.5, %v592_v20 }
 0x2ae   :  { %594 = vst [vmem:[%s1134_s5] sm:$0x1] %v593_v44 }

</bundles_post_ra>
